<compile_context>
chip_gen: v7x
topology: tpu7x:2x2x1
jax: 0.10.0
libtpu: 0.0.40
codegen_flags: <defaults>
</compile_context>

<pallas_src>
import jax
import jax.numpy as jnp
from jax import lax
from jax.experimental import pallas as pl
from jax.experimental.pallas import tpu as pltpu


def _round_up(x, m):
    return ((x + m - 1) // m) * m


def _lora_embedding_kernel(ids_ref, tables_ref, lora_b_ref, out_ref):
    # ids_ref:    (TN, 1)      int32 token ids for this tile
    # tables_ref: (V, D + RP)  [weight | lora_A.T zero-padded to RP columns]
    # lora_b_ref: (RP, D)      lora_B.T * scaling, zero-padded to RP rows
    # out_ref:    (TN, D)
    ids = ids_ref[...]                                   # (TN, 1)
    tn = ids.shape[0]
    v = tables_ref.shape[0]
    d = out_ref.shape[1]

    # One-hot gather on the MXU: onehot[t, j] = (ids[t] == j).  Built in the
    # table dtype (0/1 is exact in bf16) so the MXU gets matched operands.
    onehot = (ids == lax.broadcasted_iota(jnp.int32, (tn, v), 1)).astype(
        tables_ref.dtype)

    # Single pass of the one-hot through the MXU: gathers the base embedding
    # rows and the lora_A rows at once.
    gathered = jnp.dot(onehot, tables_ref[...],
                       preferred_element_type=jnp.float32)       # (TN, D+RP) f32
    base = gathered[:, :d]                                        # (TN, D)
    lora_a_emb = gathered[:, d:].astype(lora_b_ref.dtype)         # (TN, RP), exact

    # Low-rank expansion; scaling already folded into lora_b_ref.
    lora_term = jnp.dot(lora_a_emb, lora_b_ref[...],
                        preferred_element_type=jnp.float32)       # (TN, D)

    out_ref[...] = (base + lora_term).astype(out_ref.dtype)


def prepare_lora_embedding_params(weight, lora_A, lora_B, scaling, *,
                                  compute_dtype=jnp.bfloat16):
    """One-time parameter prep (hoisted out of the per-call path).

    Returns:
      tables:   (V, D + RP)  [weight | lora_A.T] in compute_dtype, RP = round_up(r, 128)
      lora_b_t: (RP, D)      lora_B.T * scaling in compute_dtype, zero-padded rows
    """
    V, D = weight.shape
    r = lora_A.shape[0]
    assert lora_A.shape == (r, V), lora_A.shape
    assert lora_B.shape == (D, r), lora_B.shape

    cdt = compute_dtype
    rp = _round_up(max(r, 1), 128)
    lora_a_t = jnp.pad(lora_A.T.astype(cdt), ((0, 0), (0, rp - r)))          # (V, rp)
    tables = jnp.concatenate([weight.astype(cdt), lora_a_t], axis=1)         # (V, D+rp)
    lora_b_t = jnp.pad(lora_B.T.astype(jnp.float32) * float(scaling),
                       ((0, rp - r), (0, 0))).astype(cdt)                    # (rp, D)
    return tables, lora_b_t


def lora_embedding_apply(x, tables, lora_b_t, *, out_dtype=None, token_tile=1024):
    """Apply the LoRA embedding with pre-prepared tables.

    x: int token ids of any shape; returns embeddings of shape x.shape + (D,).
    """
    V, drp = tables.shape
    rp, D = lora_b_t.shape
    assert drp == D + rp, (tables.shape, lora_b_t.shape)
    out_dtype = tables.dtype if out_dtype is None else out_dtype

    orig_shape = x.shape
    ids = x.reshape(-1).astype(jnp.int32)
    n = ids.shape[0]

    # Large tiles amortize per-grid-step cost and fill MXU rows; keep the
    # sublane dim a multiple of 8 and do not over-pad tiny inputs.
    tile = _round_up(min(max(token_tile, 8), max(n, 8)), 8)
    # If everything would fit in a single grid step but there are >= 2 sublane
    # groups of tokens, split into two steps so the "parallel" axis can shard
    # across v7x's two TensorCores.
    if n > 8 and _round_up(n, 8) <= tile:
        tile = _round_up(-(-n // 2), 8)

    pad = (-n) % tile
    ids_p = jnp.pad(ids, (0, pad)).reshape(-1, 1)                 # (Np, 1) padded with 0
    n_pad = ids_p.shape[0]

    # Explicit scoped-VMEM budget: single-buffered residents + double-buffered
    # per-step blocks + in-kernel f32 temporaries, with 2x headroom.  Matters
    # under v5e's 16 MiB default scoped limit when tile or V grows.
    cbytes = jnp.dtype(tables.dtype).itemsize
    obytes = jnp.dtype(out_dtype).itemsize
    est = (V * (D + rp) * cbytes          # tables (single-buffered, resident)
           + rp * D * cbytes              # scaled lora_B.T (single-buffered)
           + 2 * tile * D * obytes        # output block (double-buffered)
           + 2 * tile * 4                 # ids block (double-buffered)
           + tile * (V + D + rp) * 4)     # one-hot + gathered f32 temporaries
    vmem_limit = int(min(max(2 * est, 32 * 1024 * 1024), 64 * 1024 * 1024))

    # The table BlockSpecs are grid-invariant (constant index_map) and
    # single-buffered so they occupy 1x VMEM and are DMA'd once.
    out = pl.pallas_call(
        _lora_embedding_kernel,
        out_shape=jax.ShapeDtypeStruct((n_pad, D), out_dtype),
        grid_spec=pltpu.PrefetchScalarGridSpec(
            num_scalar_prefetch=0,
            grid=(n_pad // tile,),
            in_specs=[
                pl.BlockSpec((tile, 1), lambda i: (i, 0)),        # ids tile
                pl.BlockSpec((V, D + rp), lambda i: (0, 0),
                             pipeline_mode=pl.Buffered(1)),       # combined table (resident)
                pl.BlockSpec((rp, D), lambda i: (0, 0),
                             pipeline_mode=pl.Buffered(1)),       # scaled lora_B.T (resident)
            ],
            out_specs=pl.BlockSpec((tile, D), lambda i: (i, 0)),
        ),
        compiler_params=pltpu.CompilerParams(
            dimension_semantics=("parallel",),
            vmem_limit_bytes=vmem_limit),
    )(ids_p, tables, lora_b_t)

    return out[:n].reshape(*orig_shape, D)


def lora_embedding(x, weight, lora_A, lora_B, scaling, *,
                   token_tile=1024, compute_dtype=jnp.bfloat16, out_dtype=None):
    """Convenience wrapper (prep + apply).  In real use, hoist
    prepare_lora_embedding_params() out of the per-call path."""
    tables, lora_b_t = prepare_lora_embedding_params(
        weight, lora_A, lora_B, scaling, compute_dtype=compute_dtype)
    out_dtype = weight.dtype if out_dtype is None else out_dtype
    return lora_embedding_apply(x, tables, lora_b_t,
                                out_dtype=out_dtype, token_tile=token_tile)


if __name__ == "__main__":
    # Module hyper-params (small, consistent with LoraEmbedding.__init__)
    num_embeddings = 256   # V (in_features)
    embedding_dim = 128    # D (out_features)
    r = 8
    lora_alpha = 32
    scaling = lora_alpha / r

    key = jax.random.PRNGKey(0)
    k_w, k_a, k_b, k_x1, k_x2 = jax.random.split(key, 5)

    # Deterministic synthetic parameters.  (torch __init__ would leave lora_A == 0;
    # use non-zero values so the LoRA branch is actually exercised.)
    weight = jax.random.normal(k_w, (num_embeddings, embedding_dim), jnp.float32)
    lora_A = 0.02 * jax.random.normal(k_a, (r, num_embeddings), jnp.float32)
    lora_B = jax.random.normal(k_b, (embedding_dim, r), jnp.float32)

    def reference(x, w, a, b):
        # F.embedding == row gather; same math as the module forward.
        return w[x] + a.T[x] @ (b.T * scaling)

    # --- small shape consistent with the module (batch=2, seq=8), exact f32 path ---
    x_small = jax.random.randint(k_x1, (2, 8), 0, num_embeddings, dtype=jnp.int32)
    out_small = jax.block_until_ready(
        lora_embedding(x_small, weight, lora_A, lora_B, scaling,
                       compute_dtype=jnp.float32))
    ref_small = reference(x_small, weight, lora_A, lora_B)
    assert out_small.shape == (2, 8, embedding_dim)
    assert jnp.allclose(out_small, ref_small, atol=1e-3, rtol=1e-3), "f32 small mismatch"

    # bf16 reference (tables rounded to bf16, accumulation f32)
    w_b = weight.astype(jnp.bfloat16).astype(jnp.float32)
    a_b = lora_A.astype(jnp.bfloat16).astype(jnp.float32)
    b_b = (lora_B.T.astype(jnp.float32) * scaling).astype(jnp.bfloat16).astype(jnp.float32)

    # --- default bf16 fast path, prep hoisted once and reused across calls ---
    tables, lora_b_t = prepare_lora_embedding_params(
        weight, lora_A, lora_B, scaling)            # compute_dtype defaults to bf16

    x_big = jax.random.randint(k_x2, (2, 300), 0, num_embeddings, dtype=jnp.int32)
    out_big = jax.block_until_ready(
        lora_embedding_apply(x_big, tables, lora_b_t, out_dtype=weight.dtype))
    ref_big = w_b[x_big] + a_b.T[x_big] @ b_b
    assert out_big.shape == (2, 300, embedding_dim)
    assert jnp.allclose(out_big, ref_big, atol=2e-2, rtol=2e-2), "bf16 big mismatch"

    # second apply reusing the same prepared tables (no per-call prep)
    out_small_bf16 = jax.block_until_ready(
        lora_embedding_apply(x_small, tables, lora_b_t, out_dtype=weight.dtype))
    ref_small_bf16 = w_b[x_small] + a_b.T[x_small] @ b_b
    assert jnp.allclose(out_small_bf16, ref_small_bf16, atol=2e-2, rtol=2e-2), \
        "bf16 small mismatch"

    print("KERNEL_OK")
</pallas_src>

<mosaic_0001>
module attributes {stable_mosaic.version = 11 : i64} {
  func.func @_lora_embedding_kernel(%arg0: i32, %arg1: memref<8x1xi32, #tpu.memory_space<vmem>>, %arg2: memref<256x256xf32, #tpu.memory_space<vmem>>, %arg3: memref<128x128xf32, #tpu.memory_space<vmem>>, %arg4: memref<8x128xf32, #tpu.memory_space<vmem>>) attributes {dimension_semantics = [#tpu.dimension_semantics<parallel>], iteration_bounds = array<i64: 2>, scalar_prefetch = 0 : i64, scratch_operands = 0 : i64, tpu.core_type = #tpu.core_type<tc>, window_params = [{transform_indices = @transform_0, window_bounds = array<i64: 8, 1>}, {pipeline_mode = #tpu.pipeline_mode<synchronous>, transform_indices = @transform_1, window_bounds = array<i64: 256, 256>}, {pipeline_mode = #tpu.pipeline_mode<synchronous>, transform_indices = @transform_2, window_bounds = array<i64: 128, 128>}, {transform_indices = @transform_3, window_bounds = array<i64: 8, 128>}]} {
    %c0 = arith.constant 0 : index
    %c0_0 = arith.constant 0 : index
    %0 = vector.load %arg1[%c0, %c0_0] : memref<8x1xi32, #tpu.memory_space<vmem>>, vector<8x1xi32>
    %1 = tpu.iota {dimensions = array<i32: 1>} : vector<8x256xi32>
    %2 = vector.broadcast %0 : vector<8x1xi32> to vector<8x256xi32>
    %3 = arith.cmpi eq, %2, %1 : vector<8x256xi32>
    %4 = arith.extui %3 : vector<8x256xi1> to vector<8x256xi32>
    %5 = arith.sitofp %4 : vector<8x256xi32> to vector<8x256xf32>
    %c0_1 = arith.constant 0 : index
    %c0_2 = arith.constant 0 : index
    %6 = vector.load %arg2[%c0_1, %c0_2] : memref<256x256xf32, #tpu.memory_space<vmem>>, vector<256x256xf32>
    %cst = arith.constant dense<0.000000e+00> : vector<8x256xf32>
    %7 = tpu.matmul %5, %6, %cst {dimension_numbers = #tpu.dot_dimension_numbers<[1], [0], [0], [1], [0, 0, 1, 1], [], []>} : vector<8x256xf32>, vector<256x256xf32>, vector<8x256xf32> -> vector<8x256xf32>
    %8 = vector.extract_strided_slice %7 {offsets = [0, 0], sizes = [8, 128], strides = [1, 1]} : vector<8x256xf32> to vector<8x128xf32>
    %9 = vector.extract_strided_slice %7 {offsets = [0, 128], sizes = [8, 128], strides = [1, 1]} : vector<8x256xf32> to vector<8x128xf32>
    %c0_3 = arith.constant 0 : index
    %c0_4 = arith.constant 0 : index
    %10 = vector.load %arg3[%c0_3, %c0_4] : memref<128x128xf32, #tpu.memory_space<vmem>>, vector<128x128xf32>
    %cst_5 = arith.constant dense<0.000000e+00> : vector<8x128xf32>
    %11 = tpu.matmul %9, %10, %cst_5 {dimension_numbers = #tpu.dot_dimension_numbers<[1], [0], [0], [1], [0, 0, 1, 1], [], []>} : vector<8x128xf32>, vector<128x128xf32>, vector<8x128xf32> -> vector<8x128xf32>
    %12 = arith.addf %8, %11 : vector<8x128xf32>
    %c0_6 = arith.constant 0 : index
    %c0_7 = arith.constant 0 : index
    %13 = vector.load %arg4[%c0_6, %c0_7] : memref<8x128xf32, #tpu.memory_space<vmem>>, vector<8x128xf32>
    tpu.vector_store %arg4[%c0_6, %c0_7], %12 {strides = array<i32>} : memref<8x128xf32, #tpu.memory_space<vmem>>, vector<8x128xf32>,
    return
  }
  func.func @transform_0(%arg0: i32) -> (i32, i32) {
    %c0_i32 = arith.constant 0 : i32
    %c0_i32_0 = arith.constant 0 : i32
    return %arg0, %c0_i32 : i32, i32
  }
  func.func @transform_1(%arg0: i32) -> (i32, i32) {
    %c0_i32 = arith.constant 0 : i32
    %c0_i32_0 = arith.constant 0 : i32
    %c0_i32_1 = arith.constant 0 : i32
    return %c0_i32, %c0_i32_0 : i32, i32
  }
  func.func @transform_2(%arg0: i32) -> (i32, i32) {
    %c0_i32 = arith.constant 0 : i32
    %c0_i32_0 = arith.constant 0 : i32
    %c0_i32_1 = arith.constant 0 : i32
    return %c0_i32, %c0_i32_0 : i32, i32
  }
  func.func @transform_3(%arg0: i32) -> (i32, i32) {
    %c0_i32 = arith.constant 0 : i32
    %c0_i32_0 = arith.constant 0 : i32
    return %arg0, %c0_i32 : i32, i32
  }
}

</mosaic_0001>

<bundles_post_ra>
// kernel: tpu_custom_call.1
= control target key start
LH: loop header
LB: loop body
LE: loop exit
PB: predicated region body
PF: predicated region fallthrough
CT: control target
= control target key end

     0   :  { %8 = vsyncpa [#allocation3], 0  ;;  %s1095_s0 = inlined_call_operand.vmem [shape: s32[16,1], index: 0, kind: input, shape index: {}]   ;;  %s1096_s1 = inlined_call_operand.hbm [shape: f32[256,256], index: 1, kind: input, shape index: {}]   ;;  %s1097_s2 = inlined_call_operand.hbm [shape: f32[128,128], index: 2, kind: input, shape index: {}]   ;;  %s1098_s3 = inlined_call_operand.hbm [shape: f32[16,128], index: 3, kind: output, shape index: {}]  }
   0x1   :  { %9 = vsyncpa [#allocation6], 0 }
   0x2   :  { %10 = vsyncpa [#allocation4], 0 }
   0x3   :  { %12 = vsyncpa [#allocation4 + $0x1], 0  ;;  %s915_s12 = smov 0   ;;  %s917_s13 = smov 0  }
   0x4   :  { %s919_s14 = smov 0   ;;  %s921_s15 = smov 0  }
   0x5 LB: > { %s936_s16 = sadd.s32 4294967295, %s881_s15   ;;  %s527_s17 = sadd.s32 4294967294, %s881_s15   ;;  %s881_s15 = sphi %s921_s15, %s1116_s15   ;;  %s877_s14 = sphi %s919_s14, %s1115_s14   ;;  %s873_s13 = sphi %s917_s13, %s1114_s13   ;;  %s869_s12 = sphi %s915_s12, %s1113_s12  }
   0x6   : > { %s940_s18 = sadd.s32 1, %s881_s15   ;;  %s93_s19 = sadd.s32 1, %s877_s14 }
   0x7   : > { %s90_s20 = ssub.s32 %s881_s15, %s940_s18  ;;  %p103_p0 = scmp.ne.s32.totalorder %s877_s14, %s873_s13 }
   0x8   : > { %p91_p1 = scmp.eq.s32.totalorder %s90_s20, 0  ;;  %p104_p2 = scmp.eq.s32.totalorder %s936_s16, 1 }
   0x9   : > { %p109_p3 = scmp.ne.s32.totalorder %s873_s13, %s869_s12  ;;  %p110_p4 = scmp.eq.s32.totalorder %s527_s17, 1 }
   0xa   : > { %s951_s21 = scalar_select %p91_p1, %s877_s14, %s93_s19  }
   0xb   : > { %p953_p5 = por %p104_p2, %p103_p0  ;;  %p957_p6 = por %p110_p4, %p109_p3 }
   0xc   : > { %p528_p7 = scmp.ge.s32.totalorder %s881_s15, 1  ;;  %p117_p8 = scmp.lt.s32.totalorder %s881_s15, 3 }
   0xd   : > { %s1102_s22 = scalar_select %p953_p5, 1, 0 }
   0xe   : > { %s1103_s23 = scalar_select %p957_p6, 1, 0 }
   0xf   : > { %p1099_p9 = scmp.eq.s32.totalorder %s936_s16, 0  ;;  %p964_p10 = pnand %p528_p7, %p117_p8 }
  0x10   : > { %s883_s25 = smov [#allocation2]   ;;  %s884_s28 = smov [#allocation5]  }
  0x11   : > { %s1104_s24 = scalar_select %p964_p10, 1, 0 }
  0x12   : > { %s129_s26 = sshll.u32 %s883_s25, 4  ;;  %p695_p11 = pneg %p964_p10  ;;  %s130_s26 = int_to_ptr.vmem [resolvable:$true] %s129_s26 }
  0x13   : > { %s142_s29 = sshll.u32 %s884_s28, 4  ;;  %s755_s5 = scalar_lea.hbm %s1096_s1, 8192  ;;  %s976_s29 = int_to_ptr.vmem [resolvable:$true] %s142_s29 }
  0x14   : > { %p972_p12 = pnand %p1099_p9, %p695_p11  ;;  %p756_p13 = scmp.ne.s32.totalorder %s1096_s1, %s755_s5 }
  0x15   : > { %p762_p3 = scmp.lt.u32.totalorder %s755_s5, %s1096_s1 }
  0x16   : > { %p757_p0 = pneg %p972_p12 }
  0x18   : > { %p758_p1 = pnand %p757_p0, %p756_p13 }
  0x1a   : > { %p759_p2 = pneg %p758_p1 }
  0x1c   : > { %p764_p4 = pnand %p762_p3, %p759_p2 }
  0x1e   : > { %767 = shalt.err (!%p764_p4)
}
  0x1f   : > { %s768_s10 = scalar_lea.vmem %s130_s26, 8192  ;;  %p776_p9 = scmp.lt.s32.totalorder %s130_s26, %s130_s26 }
  0x20   : > { %p769_p7 = scmp.ne.s32.totalorder %s130_s26, %s768_s10  ;;  %p777_p6 = scmp.lt.s32.totalorder %s768_s10, %s768_s10 }
  0x22   : > { %p771_p8 = pnand %p769_p7, %p757_p0  ;;  %p778_p5 = por %p777_p6, %p776_p9 }
  0x24   : > { %p772_p11 = pneg %p771_p8 }
  0x26   : > { %p779_p10 = pnand %p778_p5, %p772_p11 }
  0x28   : > { %782 = shalt.err (!%p779_p10)
}
  0x29   : > { %s885_s11 = smov 256   ;;  %s886_s17 = smov 16  }
  0x2a   : > { %698 = dma.hbm_to_vmem [thread:$0]  (!%p972_p12), %s1096_s1, 8192, %s130_s26, [#allocation3], %s885_s11, %s885_s11, %s886_s17  }
  0x2b   : > { %s783_s30 = scalar_lea.hbm %s1097_s2, 2048 }
  0x2c   : > { %p784_p13 = scmp.ne.s32.totalorder %s1097_s2, %s783_s30  ;;  %p790_p9 = scmp.lt.u32.totalorder %s783_s30, %s1097_s2 }
  0x2e   : > { %p786_p5 = pnand %p784_p13, %p757_p0 }
  0x30   : > { %p787_p6 = pneg %p786_p5 }
  0x32   : > { %p792_p10 = pnand %p790_p9, %p787_p6 }
  0x34   : > { %795 = shalt.err (!%p792_p10)
}
  0x35   : > { %s796_s26 = scalar_lea.vmem %s976_s29, 2048  ;;  %p804_p4 = scmp.lt.s32.totalorder %s976_s29, %s976_s29 }
  0x36   : > { %p797_p1 = scmp.ne.s32.totalorder %s976_s29, %s796_s26  ;;  %p805_p7 = scmp.lt.s32.totalorder %s796_s26, %s796_s26 }
  0x38   : > { %p799_p2 = pnand %p797_p1, %p757_p0  ;;  %p806_p8 = por %p805_p7, %p804_p4 }
  0x3a   : > { %p800_p3 = pneg %p799_p2 }
  0x3c   : > { %p807_p11 = pnand %p806_p8, %p800_p3 }
  0x3e   : > { %810 = shalt.err (!%p807_p11)
}
  0x3f   : > { %s887_s8 = smov 128   ;;  %s888_s9 = smov 8  }
  0x40   : > { %701 = dma.hbm_to_vmem [thread:$0]  (!%p972_p12), %s1097_s2, 2048, %s976_s29, [#allocation6], %s887_s8, %s887_s8, %s888_s9  }
  0x41   : > { %p1106_p13 = scmp.ne.s32.totalorder %s1104_s24, 0 }
  0x42   : > { %p1107_p0 = scmp.eq.s32.totalorder (!%p1106_p13), %s936_s16, 0 }
  0x43   : > { %165 = sbr.rel (%p1106_p13) target bundleno = 656 (0x290), region = 32 }
  0x4a   : > { %856 = dma.done.wait (%p1107_p0), [#allocation3], 8192   ;;  %p1108_p5 = pmov %p1107_p0 }
  0x4b   : > { %p1109_p6 = pmov %p1107_p0 }
  0x4c   : > { %858 = vsyncadd (%p1108_p5), [#allocation3], 4294959104 }
  0x4d   : > { %860 = dma.done.wait (%p1109_p6), [#allocation6], 2048   ;;  %p1110_p9 = pmov %p1107_p0 }
  0x4e   : > { %p192_p10 = scmp.lt.s32.totalorder %s936_s16, 1  ;;  %v889_v0 = vmov 0   ;;  %v210_v2 = vld [vmem:[#allocation2 + $0x8] sm:$0xff]  ;;  %v212_v3 = vld [vmem:[#allocation2 + $0x18] sm:$0xff]  ;;  %v209_v5 = vld [vmem:[#allocation2] sm:$0xff]  ;;  %v890_v16 = vmov 0.0|0.0  }
  0x4f   : > { %862 = vsyncadd (%p1110_p9), [#allocation6], 4294965248  ;;  %754 = vset.pattern.permute.xlu0 %v889_v0  ;;  %v597_v4 = vpack.c.bf16 %v212_v3, %v210_v2  ;;  %v211_v6 = vld [vmem:[#allocation2 + $0x10] sm:$0xff]  ;;  %v214_v7 = vld [vmem:[#allocation2 + $0x28] sm:$0xff]  ;;  %661 = vmatprep.subr.bf16.mxu1 %v890_v16  ;;  %vm892_vm2 = vmmov 0   ;;  %s189_s20 = sand.u32 1, %s873_s13  }
  0x50   : > { %s193_s27 = scalar_select %p192_p10, %s936_s16, 1  ;;  %v599_v8 = vpack.c.bf16 %v211_v6, %v209_v5  ;;  %v216_v9 = vld [vmem:[#allocation2 + $0x38] sm:$0xff]  ;;  %v213_v10 = vld [vmem:[#allocation2 + $0x20] sm:$0xff]  ;;  %v215_v11 = vld [vmem:[#allocation2 + $0x30] sm:$0xff] }
  0x51   : > { %598 = vmatprep.subr.bf16.mxu0 %v597_v4  ;;  %v601_v12 = vpack.c.bf16 %v216_v9, %v214_v7  ;;  %v218_v13 = vld [vmem:[#allocation2 + $0x48] sm:$0xff]  ;;  %v220_v14 = vld [vmem:[#allocation2 + $0x58] sm:$0xff]  ;;  %v603_v15 = vpack.c.bf16 %v215_v11, %v213_v10  ;;  %v217_v18 = vld [vmem:[#allocation2 + $0x40] sm:$0xff]  ;;  %s535_s25 = sshll.u32 %s189_s20, 3  ;;  %s542_s28 = sshll.u32 %s936_s16, 7 }
  0x52   : > { %s536_s24 = sshll.u32 %s193_s27, 3  ;;  %600 = vmatpush1.bf16.msra.mxu0 %v599_v8  ;;  %v605_v17 = vpack.c.bf16 %v220_v14, %v218_v13  ;;  %v219_v19 = vld [vmem:[#allocation2 + $0x50] sm:$0xff]  ;;  %v222_v20 = vld [vmem:[#allocation2 + $0x68] sm:$0xff]  ;;  %v224_v21 = vld [vmem:[#allocation2 + $0x78] sm:$0xff]  ;;  %s191_s30 = scalar_lea.vmem [#allocation7], %s535_s25 }
  0x53   : > { %s195_s19 = scalar_lea.vmem %s1095_s0, %s536_s24  ;;  %602 = vmatprep.subr.bf16.mxu0 %v601_v12  ;;  %v607_v22 = vpack.c.bf16 %v219_v19, %v217_v18  ;;  %v609_v23 = vpack.c.bf16 %v224_v21, %v222_v20  ;;  %v221_v24 = vld [vmem:[#allocation2 + $0x60] sm:$0xff]  ;;  %v223_v25 = vld [vmem:[#allocation2 + $0x70] sm:$0xff]  ;;  %v226_v26 = vld [vmem:[#allocation2 + $0x88] sm:$0xff]  ;;  %s446_s4 = sshll.u32 %s191_s30, 4  ;;  %s1055_s4 = int_to_ptr.vmem [resolvable:$true] %s446_s4 }
  0x54   : > { %v196_v1 = vld [vmem:[%s195_s19] sm:$0xff]  ;;  %v228_v27 = vld [vmem:[#allocation2 + $0x98] sm:$0xff]  ;;  %v611_v28 = vpack.c.bf16 %v223_v25, %v221_v24  ;;  %v225_v30 = vld [vmem:[#allocation2 + $0x80] sm:$0xff]  ;;  %s1053_s7 = scalar_lea.hbm %s1098_s3, %s542_s28  ;;  %s433_s26 = scalar_lea.sflag [#allocation4], %s189_s20 }
  0x55   : > { %201 = vperm.xlu0 %754, %v196_v1   ;;  %v613_v29 = vpack.c.bf16 %v228_v27, %v226_v26  ;;  %v227_v31 = vld [vmem:[#allocation2 + $0x90] sm:$0xff]  ;;  %v230_v32 = vld [vmem:[#allocation2 + $0xa8] sm:$0xff]  ;;  %v232_v33 = vld [vmem:[#allocation2 + $0xb8] sm:$0xff]  ;;  %s811_s8 = scalar_lea.vmem %s1055_s4, 128  ;;  %p1111_p1 = scmp.ne.s32.totalorder %s1102_s22, 0 }
  0x56   : > { %604 = vmatpush1.bf16.msra.mxu0 %v603_v15  ;;  %v615_v34 = vpack.c.bf16 %v227_v31, %v225_v30  ;;  %v617_v35 = vpack.c.bf16 %v232_v33, %v230_v32  ;;  %v229_v36 = vld [vmem:[#allocation2 + $0xa0] sm:$0xff]  ;;  %v231_v37 = vld [vmem:[#allocation2 + $0xb0] sm:$0xff]  ;;  %v234_v38 = vld [vmem:[#allocation2 + $0xc8] sm:$0xff]  ;;  %p812_p12 = scmp.ne.s32.totalorder %s1055_s4, %s811_s8  ;;  %s894_s16 = smov [#allocation7]  }
  0x57   : > { %606 = vmatprep.subr.bf16.mxu0 %v605_v17  ;;  %v236_v39 = vld [vmem:[#allocation2 + $0xd8] sm:$0xff]  ;;  %v619_v40 = vpack.c.bf16 %v231_v37, %v229_v36  ;;  %v233_v41 = vld [vmem:[#allocation2 + $0xc0] sm:$0xff]  ;;  %v235_v42 = vld [vmem:[#allocation2 + $0xd0] sm:$0xff]  ;;  %s815_s9 = sshll.u32 %s894_s16, 4  ;;  %s816_s9 = int_to_ptr.vmem [resolvable:$false] %s815_s9 }
  0x58   : > { %v621_v43 = vpack.c.bf16 %v236_v39, %v234_v38  ;;  %v238_v44 = vld [vmem:[#allocation2 + $0xe8] sm:$0xff]  ;;  %v240_v45 = vld [vmem:[#allocation2 + $0xf8] sm:$0xff]  ;;  %v344_v46 = vld [vmem:[#allocation5] sm:$0xff]  ;;  %v623_v51 = vpack.c.bf16 %v235_v42, %v233_v41  ;;  %p813_p2 = pnand %p812_p12, %p1111_p1  ;;  %s817_s10 = scalar_lea.vmem %s816_s9, 256 }
  0x59   : > { %v345_v47 = vld [vmem:[#allocation5 + $0x8] sm:$0xff]  ;;  %v346_v48 = vld [vmem:[#allocation5 + $0x10] sm:$0xff]  ;;  %v347_v49 = vld [vmem:[#allocation5 + $0x18] sm:$0xff]  ;;  %v625_v52 = vpack.c.bf16 %v240_v45, %v238_v44  ;;  %p818_p4 = scmp.lt.s32.totalorder %s1055_s4, %s816_s9  ;;  %p819_p7 = scmp.lt.s32.totalorder %s817_s10, %s811_s8 }
  0x5a   : > { %608 = vmatpush1.bf16.msra.mxu0 %v607_v22  ;;  %v662_v50 = vpack.c.bf16 %v345_v47, %v344_v46  ;;  %v237_v53 = vld [vmem:[#allocation2 + $0xe0] sm:$0xff]  ;;  %v239_v54 = vld [vmem:[#allocation2 + $0xf0] sm:$0xff]  ;;  %v242_v55 = vld [vmem:[#allocation2 + $0x108] sm:$0xff]  ;;  %v665_v56 = vpack.c.bf16 %v347_v49, %v346_v48  ;;  %p814_p3 = pneg %p813_p2 }
  0x5b   : > { %610 = vmatprep.subr.bf16.mxu0 %v609_v23  ;;  %v244_v57 = vld [vmem:[#allocation2 + $0x118] sm:$0xff]  ;;  %v348_v58 = vld [vmem:[#allocation5 + $0x20] sm:$0xff]  ;;  %v349_v59 = vld [vmem:[#allocation5 + $0x28] sm:$0xff]  ;;  %v627_v60 = vpack.c.bf16 %v239_v54, %v237_v53  ;;  %p820_p8 = por %p819_p7, %p818_p4 }
  0x5c   : > { %663 = vmatpush3.bf16.msra.mxu1 %v662_v50  ;;  %v629_v61 = vpack.c.bf16 %v244_v57, %v242_v55  ;;  %v241_v62 = vld [vmem:[#allocation2 + $0x100] sm:$0xff]  ;;  %v243_v63 = vld [vmem:[#allocation2 + $0x110] sm:$0xff]  ;;  %v246_v0 = vld [vmem:[#allocation2 + $0x128] sm:$0xff]  ;;  %v668_v1 = vpack.c.bf16 %v349_v59, %v348_v58 }
  0x5d   : > { %664 = vmatprep.subr.bf16.mxu1 %v890_v16  ;;  %v248_v2 = vld [vmem:[#allocation2 + $0x138] sm:$0xff]  ;;  %v350_v3 = vld [vmem:[#allocation5 + $0x30] sm:$0xff]  ;;  %v631_v5 = vpack.c.bf16 %v243_v63, %v241_v62  ;;  %v245_v7 = vld [vmem:[#allocation2 + $0x120] sm:$0xff]  ;;  %v891_v63 = vmov 1.0   ;;  %p821_p11 = pnand %p820_p8, %p814_p3 }
  0x5e   : > { %612 = vmatpush1.bf16.msra.mxu0 %v611_v28  ;;  %v351_v4 = vld [vmem:[#allocation5 + $0x38] sm:$0xff]  ;;  %v633_v6 = vpack.c.bf16 %v248_v2, %v246_v0  ;;  %v247_v8 = vld [vmem:[#allocation2 + $0x130] sm:$0xff]  ;;  %v250_v9 = vld [vmem:[#allocation2 + $0x148] sm:$0xff]  ;;  %v893_v0 = vmov 0.0  }
  0x5f   : > { %614 = vmatprep.subr.bf16.mxu0 %v613_v29  ;;  %v671_v10 = vpack.c.bf16 %v351_v4, %v350_v3  ;;  %v252_v11 = vld [vmem:[#allocation2 + $0x158] sm:$0xff]  ;;  %v352_v12 = vld [vmem:[#allocation5 + $0x40] sm:$0xff]  ;;  %v353_v13 = vld [vmem:[#allocation5 + $0x48] sm:$0xff]  ;;  %v635_v14 = vpack.c.bf16 %v247_v8, %v245_v7  ;;  %594 = vmatprep.mubr.msk.f32.mxu1 %vm892_vm2, %v893_v0 }
  0x60   : > { %666 = vmatpush3.bf16.msra.mxu1 %v665_v56  ;;  %v637_v15 = vpack.c.bf16 %v252_v11, %v250_v9  ;;  %v249_v17 = vld [vmem:[#allocation2 + $0x140] sm:$0xff]  ;;  %v251_v18 = vld [vmem:[#allocation2 + $0x150] sm:$0xff]  ;;  %v254_v19 = vld [vmem:[#allocation2 + $0x168] sm:$0xff]  ;;  %v674_v20 = vpack.c.bf16 %v353_v13, %v352_v12 }
  0x61   : > { %667 = vmatprep.subr.bf16.mxu1 %v890_v16  ;;  %v256_v21 = vld [vmem:[#allocation2 + $0x178] sm:$0xff]  ;;  %v354_v22 = vld [vmem:[#allocation5 + $0x50] sm:$0xff]  ;;  %v639_v24 = vpack.c.bf16 %v251_v18, %v249_v17  ;;  %v253_v26 = vld [vmem:[#allocation2 + $0x160] sm:$0xff] }
  0x62   : > { %616 = vmatpush1.bf16.msra.mxu0 %v615_v34  ;;  %v355_v23 = vld [vmem:[#allocation5 + $0x58] sm:$0xff]  ;;  %v641_v25 = vpack.c.bf16 %v256_v21, %v254_v19  ;;  %v255_v27 = vld [vmem:[#allocation2 + $0x170] sm:$0xff]  ;;  %v258_v28 = vld [vmem:[#allocation2 + $0x188] sm:$0xff] }
  0x63   : > { %618 = vmatprep.subr.bf16.mxu0 %v617_v35  ;;  %v677_v29 = vpack.c.bf16 %v355_v23, %v354_v22  ;;  %v260_v30 = vld [vmem:[#allocation2 + $0x198] sm:$0xff]  ;;  %v356_v31 = vld [vmem:[#allocation5 + $0x60] sm:$0xff]  ;;  %v357_v32 = vld [vmem:[#allocation5 + $0x68] sm:$0xff]  ;;  %v643_v33 = vpack.c.bf16 %v255_v27, %v253_v26 }
  0x64   : > { %669 = vmatpush3.bf16.msra.mxu1 %v668_v1  ;;  %v645_v34 = vpack.c.bf16 %v260_v30, %v258_v28  ;;  %v257_v35 = vld [vmem:[#allocation2 + $0x180] sm:$0xff]  ;;  %v259_v36 = vld [vmem:[#allocation2 + $0x190] sm:$0xff]  ;;  %v262_v37 = vld [vmem:[#allocation2 + $0x1a8] sm:$0xff]  ;;  %v680_v38 = vpack.c.bf16 %v357_v32, %v356_v31 }
  0x65   : > { %670 = vmatprep.subr.bf16.mxu1 %v890_v16  ;;  %v264_v39 = vld [vmem:[#allocation2 + $0x1b8] sm:$0xff]  ;;  %v647_v42 = vpack.c.bf16 %v259_v36, %v257_v35  ;;  %v261_v44 = vld [vmem:[#allocation2 + $0x1a0] sm:$0xff]  ;;  %v263_v45 = vld [vmem:[#allocation2 + $0x1b0] sm:$0xff] }
  0x66   : > { %620 = vmatpush1.bf16.msra.mxu0 %v619_v40  ;;  %v358_v40 = vld [vmem:[#allocation5 + $0x70] sm:$0xff]  ;;  %v359_v41 = vld [vmem:[#allocation5 + $0x78] sm:$0xff]  ;;  %v266_v47 = vld [vmem:[#allocation2 + $0x1c8] sm:$0xff]  ;;  %v651_v49 = vpack.c.bf16 %v263_v45, %v261_v44 }
  0x67   : > { %622 = vmatprep.subr.bf16.mxu0 %v621_v43  ;;  %v649_v43 = vpack.c.bf16 %v264_v39, %v262_v37  ;;  %v683_v46 = vpack.c.bf16 %v359_v41, %v358_v40  ;;  %v268_v48 = vld [vmem:[#allocation2 + $0x1d8] sm:$0xff]  ;;  %v270_v53 = vld [vmem:[#allocation2 + $0x1e8] sm:$0xff]  ;;  %v269_v57 = vld [vmem:[#allocation2 + $0x1e0] sm:$0xff] }
  0x68   : > { %672 = vmatpush3.bf16.msra.mxu1 %v671_v10  ;;  %v653_v50 = vpack.c.bf16 %v268_v48, %v266_v47  ;;  %v272_v54 = vld [vmem:[#allocation2 + $0x1f8] sm:$0xff]  ;;  %v271_v58 = vld [vmem:[#allocation2 + $0x1f0] sm:$0xff] }
  0x69   : > { %673 = vmatprep.subr.bf16.mxu1 %v890_v16  ;;  %v657_v56 = vpack.c.bf16 %v272_v54, %v270_v53  ;;  %v659_v59 = vpack.c.bf16 %v271_v58, %v269_v57 }
  0x6a   : > { %624 = vmatpush1.bf16.msra.mxu0 %v623_v51  ;;  %v265_v51 = vld [vmem:[#allocation2 + $0x1c0] sm:$0xff] }
  0x6b   : > { %626 = vmatprep.subr.bf16.mxu0 %v625_v52  ;;  %v267_v52 = vld [vmem:[#allocation2 + $0x1d0] sm:$0xff] }
  0x6c   : > { %675 = vmatpush3.bf16.msra.mxu1 %v674_v20  ;;  %v655_v55 = vpack.c.bf16 %v267_v52, %v265_v51 }
  0x6d   : > { %676 = vmatprep.subr.bf16.mxu1 %v890_v16 }
  0x6e   : > { %628 = vmatpush1.bf16.msra.mxu0 %v627_v60 }
  0x6f   : > { %630 = vmatprep.subr.bf16.mxu0 %v629_v61 }
  0x70   : > { %678 = vmatpush3.bf16.msra.mxu1 %v677_v29 }
  0x71   : > { %679 = vmatprep.subr.bf16.mxu1 %v890_v16 }
  0x72   : > { %632 = vmatpush1.bf16.msra.mxu0 %v631_v5 }
  0x73   : > { %634 = vmatprep.subr.bf16.mxu0 %v633_v6 }
  0x74   : > { %681 = vmatpush3.bf16.msra.mxu1 %v680_v38 }
  0x75   : > { %682 = vmatprep.subr.bf16.mxu1 %v890_v16  ;;  %v197_v16 = vlaneseq }
  0x76   : > { %636 = vmatpush1.bf16.msra.mxu0 %v635_v14 }
  0x77   : > { %638 = vmatprep.subr.bf16.mxu0 %v637_v15  ;;  %v198_v60 = vand.u32 127, %v197_v16 }
  0x78   : > { %684 = vmatpush3.bf16.msra.mxu1 %v683_v46 }
  0x79   : > { %v199_v61 = vadd.s32 128, %v198_v60 }
  0x7a   : > { %640 = vmatpush1.bf16.msra.mxu0 %v639_v24 }
  0x7b   : > { %642 = vmatprep.subr.bf16.mxu0 %v641_v25 }
  0x7e   : > { %644 = vmatpush1.bf16.msra.mxu0 %v643_v33 }
  0x7f   : > { %646 = vmatprep.subr.bf16.mxu0 %v645_v34 }
  0x82   : > { %648 = vmatpush1.bf16.msra.mxu0 %v647_v42 }
  0x83   : > { %650 = vmatprep.subr.bf16.mxu0 %v649_v43 }
  0x86   : > { %652 = vmatpush1.bf16.msra.mxu0 %v651_v49 }
  0x87   : > { %654 = vmatprep.subr.bf16.mxu0 %v653_v50 }
  0x8a   : > { %656 = vmatpush1.bf16.msra.mxu0 %v655_v55 }
  0x8b   : > { %658 = vmatprep.subr.bf16.mxu0 %v657_v56 }
  0x8e   : > { %660 = vmatpush1.bf16.msra.mxu0 %v659_v59 }
  0xd4   : > { %v202_v62 = vpop.permute.xlu0 %201 }
  0xd5   : > { %vm203_vm0 = vcmp.eq.s32.totalorder %v202_v62, %v198_v60  ;;  %vm204_vm1 = vcmp.eq.s32.totalorder %v202_v62, %v199_v61 }
  0xd6   : > { %539 = vmatprep.mubr.msk.f32.mxu0 %vm204_vm1, %v891_v63 }
  0xd7   : > { %540 = vmatmul.mubr.msk.f32.vlgmr.msra.gmra.mrb[0].mxu0 %vm203_vm0, %v891_v63 }
 0x1aa   : > { %v339_v1 = vpop.f32.mrb[0].mxu0 }
 0x1ab   : > { %v341_v2 = vpop.f32.mrb[1].mxu0 }
 0x1ac   : > { %595 = vmatmul.mubr.f32.vlgmr.msra.gmra.mrb[0].mxu1 %v341_v2 }
 0x27f   : > { %v426_v3 = vpop.f32.mrb[0].mxu1 }
 0x280   : > { %v430_v4 = vadd.f32 %v426_v3, %v339_v1  ;;  %v596_v5 = vpop.f32.mrb[1].mxu1 }
 0x282   : > { %431 = vst [vmem:[%s191_s30] sm:$0xff] %v430_v4 }
 0x283   : > { %824 = shalt.err (!%p821_p11)
}
 0x284   : > { %s825_s11 = scalar_lea.hbm %s1053_s7, 128  ;;  %s829_s29 = scalar_lea.hbm %s1098_s3, 256 }
 0x285   : > { %p826_p13 = scmp.ne.s32.totalorder %s1053_s7, %s825_s11  ;;  %p830_p6 = scmp.lt.u32.totalorder %s1053_s7, %s1098_s3 }
 0x286   : > { %p831_p9 = scmp.lt.u32.totalorder %s829_s29, %s825_s11  ;;  %p833_p12 = scmp.lt.u32.totalorder %s825_s11, %s1053_s7 }
 0x287   : > { %p827_p0 = pnand %p826_p13, %p1111_p1 }
 0x288   : > { %p832_p10 = por %p831_p9, %p830_p6 }
 0x289   : > { %p828_p5 = pneg %p827_p0 }
 0x28a   : > { %p834_p2 = por %p833_p12, %p832_p10 }
 0x28c   : > { %p835_p3 = pnand %p834_p2, %p828_p5 }
 0x28e   : > { %838 = shalt.err (!%p835_p3)
}
 0x28f   : > { %693 = dma.vmem_to_hbm [thread:$0]  (%p1111_p1), %s1055_s4, 128, %s1053_s7, %s433_s26  }
 0x290 PF: > { %p710_p4 = scmp.ge.s32.totalorder %s881_s15, 2  ;;  %s458_s20 = sand.u32 1, %s869_s12  }
 0x291   : > { %p1112_p7 = scmp.ne.s32.totalorder %s1103_s23, 0  ;;  %s459_s25 = scalar_lea.sflag [#allocation4], %s458_s20 }
 0x293   : > { %p703_p8 = pnand %p710_p4, %p1112_p7 }
 0x295   : > { %864 = dma.done.wait (!%p703_p8), %s459_s25, 128  }
 0x296   : > { %866 = vsyncadd (!%p703_p8), %s459_s25, 4294967168  ;;  %p15_p11 = scmp.ge.s32.totalorder %s940_s18, 4   ;;  %s1113_s12 = smov %s873_s13 }
 0x297   : > { %s1114_s13 = smov %s877_s14  ;;  %s1115_s14 = smov %s951_s21 }
 0x298   : > { %s1116_s15 = smov %s940_s18  ;;  %17 = sbr.rel (!%p15_p11) target bundleno = 5 (0x5), region = 76 }
 0x29f   :  { %464 = vsyncpa [#allocation3], 1 }
 0x2a0   :  { %466 = vsyncpa [#allocation3 + $0x1], 1 }
 0x2a1   :  { %467 = vsyncpa [#allocation6], 1 }
 0x2a2   :  { %468 = vsyncpa [#allocation4], 1 }
 0x2a3   :  { %470 = vsyncpa [#allocation4 + $0x1], 1 }

</bundles_post_ra>
